<compile_context>
chip_gen: v7x
topology: tpu7x:2x2x1
jax: 0.10.0
libtpu: 0.0.40
codegen_flags: <defaults>
</compile_context>

<pallas_src>
import math
import jax
import jax.numpy as jnp
from jax.experimental import pallas as pl
from jax.experimental.pallas import tpu as pltpu

# ---- module hyperparameters (small, consistent with the module) ----
B = 2            # batch
Q = 8            # number of query tokens
QUERY_DIM = 4    # query_dim (== conv input channels)
HIDDEN = 32      # hidden_dim
NUM_HEADS = 2
HEAD_DIM = HIDDEN // NUM_HEADS
H = 16
W = 16
HW = H * W
BQ = B * Q
NORM_FACT = float(HIDDEN / NUM_HEADS) ** (-0.5)

# packed-slab row offsets (all multiples of 8 -> aligned sublane slices)
_Q_ROW = 0                    # rows [0, BQ)              : [q | 1 | 0]         [BQ, HIDDEN]
_WQ_ROW = BQ                  # rows [BQ, BQ+HIDDEN)      : [wq^T ; bq ; 0]     [HIDDEN, HIDDEN]
_WK_ROW = BQ + HIDDEN         # rows [BQ+HIDDEN, +HIDDEN) : [wk | bk | 0]       [HIDDEN, HIDDEN]
_SLAB_ROWS = BQ + 2 * HIDDEN


def _attention_map_kernel(slab_ref, k_ref, out_ref, kp_bd_ref):
    # slab_ref : [BQ + 2*HIDDEN, HIDDEN]  packed {q|1, wq^T;bq, wk|bk}  (single DMA)
    # k_ref    : [HIDDEN, B*HW]           rows 0:C = k as [C, B*HW], row C = 1, rest 0
    # out_ref  : [B, Q, NUM_HEADS*HW]
    # kp_bd_ref: [HIDDEN, NUM_HEADS*HW]   block-diagonal per-head k (VMEM scratch)
    q_aug = slab_ref[_Q_ROW:_Q_ROW + BQ, :]           # [BQ, HIDDEN]
    wq_aug = slab_ref[_WQ_ROW:_WQ_ROW + HIDDEN, :]    # [HIDDEN, HIDDEN]
    wk_aug = slab_ref[_WK_ROW:_WK_ROW + HIDDEN, :]    # [HIDDEN, HIDDEN]

    # q_linear (+bias via ones column), then normalize_fact, both batches at once.
    qp = jnp.dot(q_aug, wq_aug, preferred_element_type=jnp.float32) * NORM_FACT   # [BQ, HIDDEN]

    # 1x1-conv k projection (+bias via ones row) for BOTH batches in one MXU pass;
    # result stays lane-dense along B*HW.
    kp = jnp.dot(wk_aug, k_ref[...], preferred_element_type=jnp.float32)          # [HIDDEN, B*HW]

    # Block-diagonal kp: head-n rows live at lane block n*HW, so ONE
    # [Q, HIDDEN] @ [HIDDEN, N*HW] dot yields all per-head scores without any
    # sub-128-lane slicing of qp. Off-diagonal blocks stay zero across batches.
    kp_bd_ref[...] = jnp.zeros_like(kp_bd_ref)

    for b in range(B):                      # B = 2, unrolled at trace time
        for n in range(NUM_HEADS):          # sublane(16)/lane(256) aligned stores
            kp_bd_ref[n * HEAD_DIM:(n + 1) * HEAD_DIM, n * HW:(n + 1) * HW] = (
                kp[n * HEAD_DIM:(n + 1) * HEAD_DIM, b * HW:(b + 1) * HW])

        qb = qp[b * Q:(b + 1) * Q, :]                                              # [Q, HIDDEN]
        scores = jnp.dot(qb, kp_bd_ref[...], preferred_element_type=jnp.float32)   # [Q, N*HW]

        # joint softmax over (head, h, w) on one 512-lane slab
        m = scores.max(axis=-1, keepdims=True)
        e = jnp.exp(scores - m)
        denom = e.sum(axis=-1, keepdims=True)
        inv = pl.reciprocal(denom, approx=True)       # EUP slot (otherwise idle)
        inv = inv * (2.0 - denom * inv)               # one Newton step -> fp32-accurate
        # lane-dense, unmasked 512-wide store
        out_ref[b, :, :] = (e * inv).astype(out_ref.dtype)

    # TODO(synk): dropout is identity here (p=0.0 / eval mode); mask=None path only.


def mh_attention_map(q, k, wq, bq, wk, bk):
    """q: [B, Q, C] ; k: [B, C, H, W] (NCHW) ; returns [B, Q, N, H, W]."""
    Bq, Qn, C = q.shape
    _, Ck, Hh, Ww = k.shape
    assert C == Ck == QUERY_DIM and Hh == H and Ww == W and Bq == B and Qn == Q

    # ---- layout plumbing (tiny, one-off, fuses into a couple of XLA ops) ----
    # k: NCHW -> [C, B*HW] (hw = h*W + w), bias folded via a row of ones, zero
    # padded to HIDDEN rows so the kernel's wk block is a full-width slab.
    k_cbs = jnp.transpose(k.reshape(Bq, C, Hh * Ww), (1, 0, 2)).reshape(C, Bq * Hh * Ww)
    k_aug = jnp.zeros((HIDDEN, Bq * Hh * Ww), jnp.float32)
    k_aug = k_aug.at[:C, :].set(k_cbs.astype(jnp.float32)).at[C, :].set(1.0)

    # single packed slab (queries + both weight matrices + both biases): 1 DMA.
    slab = jnp.zeros((_SLAB_ROWS, HIDDEN), jnp.float32)
    slab = slab.at[_Q_ROW:_Q_ROW + BQ, :C].set(q.reshape(BQ, C).astype(jnp.float32))
    slab = slab.at[_Q_ROW:_Q_ROW + BQ, C].set(1.0)                    # folds bq
    slab = slab.at[_WQ_ROW:_WQ_ROW + C, :].set(wq.T.astype(jnp.float32))
    slab = slab.at[_WQ_ROW + C, :].set(bq.astype(jnp.float32))
    slab = slab.at[_WK_ROW:_WK_ROW + HIDDEN, :C].set(wk.astype(jnp.float32))
    slab = slab.at[_WK_ROW:_WK_ROW + HIDDEN, C].set(bk.astype(jnp.float32))  # folds bk

    # Single grid-less invocation: whole problem (<100 KiB) lives in VMEM; a
    # grid would only add ~0.35us/step pipeline overhead on every TPU gen.
    out_flat = pl.pallas_call(
        _attention_map_kernel,
        out_shape=jax.ShapeDtypeStruct((Bq, Qn, NUM_HEADS * Hh * Ww), jnp.float32),
        scratch_shapes=[pltpu.VMEM((HIDDEN, NUM_HEADS * Hh * Ww), jnp.float32)],
    )(slab, k_aug)

    return out_flat.reshape(Bq, Qn, NUM_HEADS, Hh, Ww)


def _reference(q, k, wq, bq, wk, bk):
    """Pure-JAX reference reproducing the PyTorch forward."""
    qp = q @ wq.T + bq                                                 # [B,Q,HIDDEN]
    kp = jnp.einsum('bchw,oc->bohw', k, wk) + bk[None, :, None, None]  # [B,HIDDEN,H,W]
    qh = qp.reshape(B, Q, NUM_HEADS, HEAD_DIM)
    kh = kp.reshape(B, NUM_HEADS, HEAD_DIM, H, W)
    wts = jnp.einsum('bqnc,bnchw->bqnhw', qh * NORM_FACT, kh)
    flat = wts.reshape(B, Q, -1)
    flat = jax.nn.softmax(flat, axis=-1)
    return flat.reshape(wts.shape)


if __name__ == "__main__":
    key = jax.random.PRNGKey(0)
    k0, k1, k2, k3 = jax.random.split(key, 4)

    # deterministic parameter init (matching the module __init__):
    # xavier_uniform weights, zero biases
    bound = math.sqrt(6.0 / (QUERY_DIM + HIDDEN))
    wq = jax.random.uniform(k0, (HIDDEN, QUERY_DIM), jnp.float32, -bound, bound)
    wk = jax.random.uniform(k1, (HIDDEN, QUERY_DIM), jnp.float32, -bound, bound)
    bq = jnp.zeros((HIDDEN,), jnp.float32)
    bk = jnp.zeros((HIDDEN,), jnp.float32)

    # example inputs
    q_in = jax.random.normal(k2, (B, Q, QUERY_DIM), jnp.float32)
    k_in = jax.random.normal(k3, (B, QUERY_DIM, H, W), jnp.float32)  # NCHW

    out = mh_attention_map(q_in, k_in, wq, bq, wk, bk)
    out = jax.block_until_ready(out)

    ref = _reference(q_in, k_in, wq, bq, wk, bk)
    assert out.shape == (B, Q, NUM_HEADS, H, W)
    assert jnp.allclose(out, ref, atol=1e-5, rtol=1e-5)

    print("KERNEL_OK")
</pallas_src>

<mosaic_0001>
module attributes {stable_mosaic.version = 11 : i64} {
  func.func @_attention_map_kernel(%arg0: memref<80x32xf32, #tpu.memory_space<vmem>>, %arg1: memref<32x512xf32, #tpu.memory_space<vmem>>, %arg2: memref<2x8x512xf32, #tpu.memory_space<vmem>>, %arg3: memref<32x512xf32, #tpu.memory_space<vmem>>) attributes {dimension_semantics = [], scalar_prefetch = 0 : i64, scratch_operands = 1 : i64, tpu.core_type = #tpu.core_type<tc>} {
    %c0 = arith.constant 0 : index
    %c0_0 = arith.constant 0 : index
    %0 = vector.load %arg0[%c0, %c0_0] : memref<80x32xf32, #tpu.memory_space<vmem>>, vector<16x32xf32>
    %c16 = arith.constant 16 : index
    %c0_1 = arith.constant 0 : index
    %1 = vector.load %arg0[%c16, %c0_1] : memref<80x32xf32, #tpu.memory_space<vmem>>, vector<32x32xf32>
    %c48 = arith.constant 48 : index
    %c0_2 = arith.constant 0 : index
    %2 = vector.load %arg0[%c48, %c0_2] : memref<80x32xf32, #tpu.memory_space<vmem>>, vector<32x32xf32>
    %cst = arith.constant dense<0.000000e+00> : vector<16x32xf32>
    %3 = tpu.matmul %0, %1, %cst {dimension_numbers = #tpu.dot_dimension_numbers<[1], [0], [0], [1], [0, 0, 1, 1], [], []>} : vector<16x32xf32>, vector<32x32xf32>, vector<16x32xf32> -> vector<16x32xf32>
    %cst_3 = arith.constant 2.500000e-01 : f32
    %4 = vector.broadcast %cst_3 : f32 to vector<16x32xf32>
    %5 = arith.mulf %3, %4 : vector<16x32xf32>
    %c0_4 = arith.constant 0 : index
    %c0_5 = arith.constant 0 : index
    %6 = vector.load %arg1[%c0_4, %c0_5] : memref<32x512xf32, #tpu.memory_space<vmem>>, vector<32x512xf32>
    %cst_6 = arith.constant dense<0.000000e+00> : vector<32x512xf32>
    %7 = tpu.matmul %2, %6, %cst_6 {dimension_numbers = #tpu.dot_dimension_numbers<[1], [0], [0], [1], [0, 0, 1, 1], [], []>} : vector<32x32xf32>, vector<32x512xf32>, vector<32x512xf32> -> vector<32x512xf32>
    %cst_7 = arith.constant 0.000000e+00 : f32
    %8 = vector.broadcast %cst_7 : f32 to vector<32x512xf32>
    %c0_8 = arith.constant 0 : index
    %c0_9 = arith.constant 0 : index
    %9 = vector.load %arg3[%c0_8, %c0_9] : memref<32x512xf32, #tpu.memory_space<vmem>>, vector<32x512xf32>
    tpu.vector_store %arg3[%c0_8, %c0_9], %8 {strides = array<i32>} : memref<32x512xf32, #tpu.memory_space<vmem>>, vector<32x512xf32>,
    %10 = vector.extract_strided_slice %7 {offsets = [0, 0], sizes = [16, 256], strides = [1, 1]} : vector<32x512xf32> to vector<16x256xf32>
    %c0_10 = arith.constant 0 : index
    %c0_11 = arith.constant 0 : index
    %11 = vector.load %arg3[%c0_10, %c0_11] : memref<32x512xf32, #tpu.memory_space<vmem>>, vector<16x256xf32>
    tpu.vector_store %arg3[%c0_10, %c0_11], %10 {strides = array<i32>} : memref<32x512xf32, #tpu.memory_space<vmem>>, vector<16x256xf32>,
    %12 = vector.extract_strided_slice %7 {offsets = [16, 0], sizes = [16, 256], strides = [1, 1]} : vector<32x512xf32> to vector<16x256xf32>
    %c16_12 = arith.constant 16 : index
    %c256 = arith.constant 256 : index
    %13 = vector.load %arg3[%c16_12, %c256] : memref<32x512xf32, #tpu.memory_space<vmem>>, vector<16x256xf32>
    tpu.vector_store %arg3[%c16_12, %c256], %12 {strides = array<i32>} : memref<32x512xf32, #tpu.memory_space<vmem>>, vector<16x256xf32>,
    %14 = vector.extract_strided_slice %5 {offsets = [0, 0], sizes = [8, 32], strides = [1, 1]} : vector<16x32xf32> to vector<8x32xf32>
    %c0_13 = arith.constant 0 : index
    %c0_14 = arith.constant 0 : index
    %15 = vector.load %arg3[%c0_13, %c0_14] : memref<32x512xf32, #tpu.memory_space<vmem>>, vector<32x512xf32>
    %cst_15 = arith.constant dense<0.000000e+00> : vector<8x512xf32>
    %16 = tpu.matmul %14, %15, %cst_15 {dimension_numbers = #tpu.dot_dimension_numbers<[1], [0], [0], [1], [0, 0, 1, 1], [], []>} : vector<8x32xf32>, vector<32x512xf32>, vector<8x512xf32> -> vector<8x512xf32>
    %cst_16 = arith.constant dense<0xFF800000> : vector<8xf32>
    %17 = vector.multi_reduction <maximumf>, %16, %cst_16 [1] : vector<8x512xf32> to vector<8xf32>
    %18 = vector.shape_cast %17 : vector<8xf32> to vector<8x1xf32>
    %19 = vector.broadcast %18 : vector<8x1xf32> to vector<8x512xf32>
    %20 = arith.subf %16, %19 : vector<8x512xf32>
    %21 = math.exp %20 : vector<8x512xf32>
    %cst_17 = arith.constant dense<0.000000e+00> : vector<8xf32>
    %22 = vector.multi_reduction <add>, %21, %cst_17 [1] : vector<8x512xf32> to vector<8xf32>
    %23 = vector.shape_cast %22 : vector<8xf32> to vector<8x1xf32>
    %24 = tpu.reciprocal %23 {approx = true} : vector<8x1xf32> -> vector<8x1xf32>
    %25 = arith.mulf %23, %24 : vector<8x1xf32>
    %cst_18 = arith.constant 2.000000e+00 : f32
    %26 = vector.broadcast %cst_18 : f32 to vector<8x1xf32>
    %27 = arith.subf %26, %25 : vector<8x1xf32>
    %28 = arith.mulf %24, %27 : vector<8x1xf32>
    %29 = vector.broadcast %28 : vector<8x1xf32> to vector<8x512xf32>
    %30 = arith.mulf %21, %29 : vector<8x512xf32>
    %c0_19 = arith.constant 0 : index
    %c0_20 = arith.constant 0 : index
    %c0_21 = arith.constant 0 : index
    %31 = vector.load %arg2[%c0_19, %c0_20, %c0_21] : memref<2x8x512xf32, #tpu.memory_space<vmem>>, vector<1x8x512xf32>
    %32 = vector.shape_cast %31 : vector<1x8x512xf32> to vector<8x512xf32>
    %33 = vector.shape_cast %30 : vector<8x512xf32> to vector<1x8x512xf32>
    tpu.vector_store %arg2[%c0_19, %c0_20, %c0_21], %33 {strides = array<i32>} : memref<2x8x512xf32, #tpu.memory_space<vmem>>, vector<1x8x512xf32>,
    %34 = vector.extract_strided_slice %7 {offsets = [0, 256], sizes = [16, 256], strides = [1, 1]} : vector<32x512xf32> to vector<16x256xf32>
    %c0_22 = arith.constant 0 : index
    %c0_23 = arith.constant 0 : index
    %35 = vector.load %arg3[%c0_22, %c0_23] : memref<32x512xf32, #tpu.memory_space<vmem>>, vector<16x256xf32>
    tpu.vector_store %arg3[%c0_22, %c0_23], %34 {strides = array<i32>} : memref<32x512xf32, #tpu.memory_space<vmem>>, vector<16x256xf32>,
    %36 = vector.extract_strided_slice %7 {offsets = [16, 256], sizes = [16, 256], strides = [1, 1]} : vector<32x512xf32> to vector<16x256xf32>
    %c16_24 = arith.constant 16 : index
    %c256_25 = arith.constant 256 : index
    %37 = vector.load %arg3[%c16_24, %c256_25] : memref<32x512xf32, #tpu.memory_space<vmem>>, vector<16x256xf32>
    tpu.vector_store %arg3[%c16_24, %c256_25], %36 {strides = array<i32>} : memref<32x512xf32, #tpu.memory_space<vmem>>, vector<16x256xf32>,
    %38 = vector.extract_strided_slice %5 {offsets = [8, 0], sizes = [8, 32], strides = [1, 1]} : vector<16x32xf32> to vector<8x32xf32>
    %c0_26 = arith.constant 0 : index
    %c0_27 = arith.constant 0 : index
    %39 = vector.load %arg3[%c0_26, %c0_27] : memref<32x512xf32, #tpu.memory_space<vmem>>, vector<32x512xf32>
    %cst_28 = arith.constant dense<0.000000e+00> : vector<8x512xf32>
    %40 = tpu.matmul %38, %39, %cst_28 {dimension_numbers = #tpu.dot_dimension_numbers<[1], [0], [0], [1], [0, 0, 1, 1], [], []>} : vector<8x32xf32>, vector<32x512xf32>, vector<8x512xf32> -> vector<8x512xf32>
    %cst_29 = arith.constant dense<0xFF800000> : vector<8xf32>
    %41 = vector.multi_reduction <maximumf>, %40, %cst_29 [1] : vector<8x512xf32> to vector<8xf32>
    %42 = vector.shape_cast %41 : vector<8xf32> to vector<8x1xf32>
    %43 = vector.broadcast %42 : vector<8x1xf32> to vector<8x512xf32>
    %44 = arith.subf %40, %43 : vector<8x512xf32>
    %45 = math.exp %44 : vector<8x512xf32>
    %cst_30 = arith.constant dense<0.000000e+00> : vector<8xf32>
    %46 = vector.multi_reduction <add>, %45, %cst_30 [1] : vector<8x512xf32> to vector<8xf32>
    %47 = vector.shape_cast %46 : vector<8xf32> to vector<8x1xf32>
    %48 = tpu.reciprocal %47 {approx = true} : vector<8x1xf32> -> vector<8x1xf32>
    %49 = arith.mulf %47, %48 : vector<8x1xf32>
    %cst_31 = arith.constant 2.000000e+00 : f32
    %50 = vector.broadcast %cst_31 : f32 to vector<8x1xf32>
    %51 = arith.subf %50, %49 : vector<8x1xf32>
    %52 = arith.mulf %48, %51 : vector<8x1xf32>
    %53 = vector.broadcast %52 : vector<8x1xf32> to vector<8x512xf32>
    %54 = arith.mulf %45, %53 : vector<8x512xf32>
    %c1 = arith.constant 1 : index
    %c0_32 = arith.constant 0 : index
    %c0_33 = arith.constant 0 : index
    %55 = vector.load %arg2[%c1, %c0_32, %c0_33] : memref<2x8x512xf32, #tpu.memory_space<vmem>>, vector<1x8x512xf32>
    %56 = vector.shape_cast %55 : vector<1x8x512xf32> to vector<8x512xf32>
    %57 = vector.shape_cast %54 : vector<8x512xf32> to vector<1x8x512xf32>
    tpu.vector_store %arg2[%c1, %c0_32, %c0_33], %57 {strides = array<i32>} : memref<2x8x512xf32, #tpu.memory_space<vmem>>, vector<1x8x512xf32>,
    return
  }
}

</mosaic_0001>

<bundles_post_ra>
// kernel: tpu_custom_call.1
= control target key start
LH: loop header
LB: loop body
LE: loop exit
PB: predicated region body
PF: predicated region fallthrough
CT: control target
= control target key end

     0   :  { %7 = vsyncpa [#allocation4], 0  ;;  %s1022_s0 = inlined_call_operand.vmem [shape: f32[80,32], index: 0, kind: input, shape index: {}]   ;;  %s1023_s1 = inlined_call_operand.hbm [shape: f32[32,512], index: 1, kind: input, shape index: {}]   ;;  %s1024_s2 = inlined_call_operand.hbm [shape: f32[2,8,512], index: 2, kind: output, shape index: {}]  }
   0x1   :  { %8 = vsyncpa [#allocation5], 0  ;;  %s915_s9 = smov [#allocation3]   ;;  %s867_s13 = scalar_lea.hbm %s1023_s1, 2048 }
   0x2   :  { %s16_s10 = sshll.u32 %s915_s9, 4  ;;  %p868_p0 = scmp.ne.s32.totalorder %s1023_s1, %s867_s13  ;;  %s17_s10 = int_to_ptr.vmem [resolvable:$true] %s16_s10 }
   0x3   :  { %p871_p1 = scmp.lt.u32.totalorder %s867_s13, %s1023_s1 }
   0x5   :  { %p873_p2 = pnand %p871_p1, %p868_p0 }
   0x7   :  { %876 = shalt.err (!%p873_p2)
}
   0x8   :  { %s877_s18 = scalar_lea.vmem %s17_s10, 2048  ;;  %p882_p4 = scmp.lt.s32.totalorder %s17_s10, %s17_s10 }
   0x9   :  { %p878_p3 = scmp.ne.s32.totalorder %s17_s10, %s877_s18  ;;  %p883_p5 = scmp.lt.s32.totalorder %s877_s18, %s877_s18 }
   0xb   :  { %p884_p6 = por %p883_p5, %p882_p4 }
   0xd   :  { %p885_p7 = pnand %p884_p6, %p878_p3 }
   0xf   :  { %888 = shalt.err (!%p885_p7)
}
  0x10   :  { %s916_s19 = smov 512   ;;  %s917_s20 = smov 32  }
  0x11   :  { %22 = dma.hbm_to_vmem [thread:$0]  %s1023_s1, 2048, %s17_s10, [#allocation4], %s916_s19, %s916_s19, %s917_s20  }
  0x12   :  { %911 = dma.done.wait [#allocation4], 2048  }
  0x13   :  { %912 = vsyncadd [#allocation4], 4294965248  ;;  %v918_v0 = vmov 0.0   ;;  %v28_v1 = vld [vmem:[%s1022_s0 + $0x10] sm:$0xff]  ;;  %v29_v2 = vld [vmem:[%s1022_s0 + $0x18] sm:$0xff]  ;;  %vm36_vm0 = vcmask 261120  }
  0x14   :  { %212 = vmatprep.mubr.f32.mxu1 %v918_v0  ;;  %v121_v3 = vld [vmem:[#allocation3 + $0x8] sm:$0xff]  ;;  %v797_v4 = vpack.c.bf16 %v29_v2, %v28_v1  ;;  %v120_v6 = vld [vmem:[#allocation3] sm:$0xff]  ;;  %v123_v19 = vld [vmem:[#allocation3 + $0x18] sm:$0xff]  ;;  %v919_v37 = vmov 0.0|0.0  }
  0x15   :  { %v125_v5 = vld [vmem:[#allocation3 + $0x28] sm:$0xff]  ;;  %v124_v7 = vld [vmem:[#allocation3 + $0x20] sm:$0xff]  ;;  %v127_v21 = vld [vmem:[#allocation3 + $0x38] sm:$0xff] }
  0x16   :  { %v805_v8 = vpack.c.bf16 %v125_v5, %v121_v3  ;;  %v807_v9 = vpack.c.bf16 %v124_v7, %v120_v6  ;;  %v30_v10 = vld [vmem:[%s1022_s0 + $0x20] sm:$0xff]  ;;  %v31_v11 = vld [vmem:[%s1022_s0 + $0x28] sm:$0xff]  ;;  %798 = vmatprep.subr.bf16.mxu0 %v797_v4  ;;  %v122_v22 = vld [vmem:[#allocation3 + $0x10] sm:$0xff]  ;;  %v813_v23 = vpack.c.bf16 %v127_v21, %v123_v19 }
  0x17   :  { %v129_v12 = vld [vmem:[#allocation3 + $0x48] sm:$0xff]  ;;  %v801_v13 = vpack.c.bf16 %v31_v11, %v30_v10  ;;  %v128_v15 = vld [vmem:[#allocation3 + $0x40] sm:$0xff]  ;;  %800 = vmatpush3.bf16.msra.mxu0 %v797_v4  ;;  %v126_v24 = vld [vmem:[#allocation3 + $0x30] sm:$0xff] }
  0x18   :  { %v133_v14 = vld [vmem:[#allocation3 + $0x68] sm:$0xff]  ;;  %v132_v16 = vld [vmem:[#allocation3 + $0x60] sm:$0xff]  ;;  %806 = vmatprep.subr.bf16.mxu1 %v805_v8  ;;  %v131_v25 = vld [vmem:[#allocation3 + $0x58] sm:$0xff]  ;;  %v815_v28 = vpack.c.bf16 %v126_v24, %v122_v22 }
  0x19   :  { %v809_v17 = vpack.c.bf16 %v133_v14, %v129_v12  ;;  %v26_v18 = vld [vmem:[%s1022_s0] sm:$0xff]  ;;  %808 = vmatpush1.bf16.msra.mxu1 %v807_v9  ;;  %802 = vmatprep.subr.bf16.mxu0 %v801_v13  ;;  %v811_v20 = vpack.c.bf16 %v132_v16, %v128_v15  ;;  %v135_v26 = vld [vmem:[#allocation3 + $0x78] sm:$0xff]  ;;  %v27_v27 = vld [vmem:[%s1022_s0 + $0x8] sm:$0xff] }
  0x1a   :  { %794 = vmatprep.mubr.msk.f32.mxu0 %vm36_vm0, %v26_v18  ;;  %v32_v29 = vld [vmem:[%s1022_s0 + $0x30] sm:$0xff]  ;;  %v817_v30 = vpack.c.bf16 %v135_v26, %v131_v25  ;;  %v33_v34 = vld [vmem:[%s1022_s0 + $0x38] sm:$0xff]  ;;  %v34_v35 = vld [vmem:[%s1022_s0 + $0x40] sm:$0xff] }
  0x1b   :  { %810 = vmatprep.subr.bf16.mxu1 %v809_v17  ;;  %804 = vmatpush3.bf16.msra.mxu0 %v801_v13  ;;  %v130_v31 = vld [vmem:[#allocation3 + $0x50] sm:$0xff]  ;;  %v35_v36 = vld [vmem:[%s1022_s0 + $0x48] sm:$0xff]  ;;  %s920_s0 = smov [#allocation6]  }
  0x1c   :  { %814 = vmatprep.subr.bf16.mxu0 %v813_v23  ;;  %v134_v32 = vld [vmem:[#allocation3 + $0x70] sm:$0xff]  ;;  %s754_s14 = sshll.u32 %s920_s0, 4  ;;  %s755_s14 = int_to_ptr.vmem [resolvable:$true] %s754_s14 }
  0x1d   :  { %812 = vmatpush1.bf16.msra.mxu1 %v811_v20  ;;  %v819_v33 = vpack.c.bf16 %v134_v32, %v130_v31  ;;  %s889_s15 = scalar_lea.vmem %s755_s14, 1024  ;;  %p894_p9 = scmp.lt.s32.totalorder %s755_s14, %s755_s14 }
  0x1e   :  { %795 = vmatmul.mubr.msk.f32.vlgmr.msra.gmra.mrb[0].mxu0 %vm36_vm0, %v27_v27  ;;  %p890_p8 = scmp.ne.s32.totalorder %s755_s14, %s889_s15  ;;  %p895_p10 = scmp.lt.s32.totalorder %s889_s15, %s889_s15 }
  0x1f   :  { %816 = vmatpush1.bf16.msra.mxu0 %v815_v28  ;;  %301 = vmatprep.mubr.f32.mxu0 %v918_v0 }
  0x20   :  { %768 = vmatmul.mubr.msk.f32.vlgmr.msra.gmra.mrb[0].mxu1 %vm36_vm0, %v32_v29  ;;  %818 = vmatprep.subr.bf16.mxu0 %v817_v30  ;;  %p896_p11 = por %p895_p10, %p894_p9 }
  0x21   :  { %218 = vmatprep.mubr.f32.mxu1 %v918_v0 }
  0x22   :  { %p897_p12 = pnand %p896_p11, %p890_p8 }
  0x23   :  { %820 = vmatpush1.bf16.msra.mxu0 %v819_v33 }
  0x24   :  { %769 = vmatmul.mubr.msk.f32.gmra.mrb[2].mxu1 %vm36_vm0, %v33_v34  ;;  %825 = vmatprep.subr.bf16.mxu0 %v919_v37 }
  0x25   :  { %224 = vmatprep.mubr.f32.mxu1 %v918_v0 }
  0x26   :  { %772 = vmatmul.mubr.msk.f32.vlgmr.msra.gmra.mrb[2].mxu0 %vm36_vm0, %v32_v29 }
  0x27   :  { %307 = vmatprep.mubr.f32.mxu0 %v918_v0  ;;  %826 = vmatpush1.bf16.msra.mxu0 %v919_v37 }
  0x28   :  { %770 = vmatmul.mubr.msk.f32.gmra.mrb[4].mxu1 %vm36_vm0, %v34_v35 }
  0x29   :  { %230 = vmatprep.mubr.f32.mxu1 %v918_v0 }
  0x2a   :  { %773 = vmatmul.mubr.msk.f32.gmra.mrb[4].mxu0 %vm36_vm0, %v33_v34 }
  0x2b   :  { %313 = vmatprep.mubr.f32.mxu0 %v918_v0 }
  0x2c   :  { %771 = vmatmul.mubr.msk.f32.gmra.mrb[6].mxu1 %vm36_vm0, %v35_v36 }
  0x2d   :  { %433 = vmatprep.mubr.f32.mxu1 %v918_v0 }
  0x2e   :  { %774 = vmatmul.mubr.msk.f32.gmra.mrb[6].mxu0 %vm36_vm0, %v34_v35 }
  0x2f   :  { %319 = vmatprep.mubr.f32.mxu0 %v918_v0 }
  0x32   :  { %775 = vmatmul.mubr.msk.f32.gmra.mrb[8].mxu0 %vm36_vm0, %v35_v36 }
  0x33   :  { %504 = vmatprep.mubr.f32.mxu0 %v918_v0 }
  0xf1   :  { %v796_v38 = vpop.f32.mrb[0].mxu0 }
  0xf2   :  { %v109_v40 = vpop.f32.mrb[1].mxu0  ;;  %v119_v61 = vmul.f32 0.25, %v796_v38 }
  0xf3   :  { %v214_v39 = vpop.f32.mrb[0].mxu1  ;;  %v118_v50 = vmul.f32 0.25, %v109_v40 }
  0xf4   :  { %v216_v41 = vpop.f32.mrb[1].mxu1 }
  0xf7   :  { %v220_v42 = vpop.f32.mrb[2].mxu1 }
  0xf8   :  { %v823_v43 = vpack.c.bf16 %v220_v42, %v214_v39  ;;  %v222_v44 = vpop.f32.mrb[3].mxu1 }
  0xf9   :  { %v821_v45 = vpack.c.bf16 %v222_v44, %v216_v41  ;;  %v303_v46 = vpop.f32.mrb[2].mxu0 }
  0xfa   :  { %v305_v48 = vpop.f32.mrb[3].mxu0 }
  0xfb   :  { %822 = vmatprep.subr.bf16.mxu1 %v821_v45  ;;  %v226_v47 = vpop.f32.mrb[4].mxu1 }
  0xfc   :  { %824 = vmatpush1.bf16.msra.mxu1 %v823_v43  ;;  %v228_v49 = vpop.f32.mrb[5].mxu1 }
  0xfd   :  { %v309_v51 = vpop.f32.mrb[4].mxu0 }
  0xfe   :  { %v833_v53 = vpack.c.bf16 %v309_v51, %v303_v46  ;;  %v311_v54 = vpop.f32.mrb[5].mxu0 }
  0xff   :  { %v232_v52 = vpop.f32.mrb[6].mxu1  ;;  %776 = vmatmul.mubr.msk.f32.vlgmr.msra.gmra.mrb[8].mxu1 %vm36_vm0, %v118_v50  ;;  %v831_v57 = vpack.c.bf16 %v311_v54, %v305_v48 }
 0x100   :  { %v829_v55 = vpack.c.bf16 %v232_v52, %v226_v47  ;;  %v234_v56 = vpop.f32.mrb[7].mxu1  ;;  %636 = vmatprep.mubr.f32.mxu1 %v918_v0 }
 0x101   :  { %v827_v58 = vpack.c.bf16 %v234_v56, %v228_v49  ;;  %832 = vmatprep.subr.bf16.mxu1 %v831_v57  ;;  %v315_v59 = vpop.f32.mrb[6].mxu0 }
 0x102   :  { %834 = vmatpush1.bf16.msra.mxu1 %v833_v53  ;;  %v317_v60 = vpop.f32.mrb[7].mxu0 }
 0x103   :  { %828 = vmatprep.subr.bf16.mxu0 %v827_v58  ;;  %835 = vmatprep.subr.bf16.mxu1 %v919_v37 }
 0x104   :  { %830 = vmatpush1.bf16.msra.mxu0 %v829_v55 }
 0x105   :  { %v321_v62 = vpop.f32.mrb[8].mxu0  ;;  %778 = vmatmul.mubr.msk.f32.vlgmr.msra.gmra.mrb[10].mxu1 %vm36_vm0, %v119_v61 }
 0x106   :  { %v839_v63 = vpack.c.bf16 %v321_v62, %v315_v59  ;;  %v323_v1 = vpop.f32.mrb[9].mxu0  ;;  %836 = vmatpush1.bf16.msra.mxu1 %v919_v37  ;;  %707 = vmatprep.mubr.f32.mxu1 %v918_v0 }
 0x107   :  { %777 = vmatmul.mubr.msk.f32.vlgmr.msra.gmra.mrb[10].mxu0 %vm36_vm0, %v118_v50  ;;  %v837_v2 = vpack.c.bf16 %v323_v1, %v317_v60 }
 0x109   :  { %838 = vmatprep.subr.bf16.mxu1 %v837_v2 }
 0x10a   :  { %840 = vmatpush1.bf16.msra.mxu1 %v839_v63 }
 0x10d   :  { %779 = vmatmul.mubr.msk.f32.vlgmr.msra.gmra.mrb[12].mxu1 %vm36_vm0, %v119_v61 }
 0x1d2   :  { %v435_v3 = vpop.f32.mrb[8].mxu1 }
 0x1d3   :  { %v437_v4 = vpop.f32.mrb[9].mxu1 }
 0x1d4   :  { %v511_v5 = vmax.f32 %v435_v3, %v437_v4 }
 0x1d8   :  { %v638_v6 = vpop.f32.mrb[10].mxu1 }
 0x1d9   :  { %v640_v8 = vpop.f32.mrb[11].mxu1 }
 0x1da   :  { %v506_v7 = vpop.f32.mrb[10].mxu0  ;;  %v714_v10 = vmax.f32 %v638_v6, %v640_v8 }
 0x1db   :  { %v508_v9 = vpop.f32.mrb[11].mxu0 }
 0x1dc   :  { %v512_v11 = vmax.f32 %v506_v7, %v508_v9 }
 0x1de   :  { %v513_v12 = vmax.f32 %v511_v5, %v512_v11 }
 0x1e0   :  { %514 = vmax.xlane.f32.xlu0 %v513_v12  ;;  %v709_v13 = vpop.f32.mrb[12].mxu1 }
 0x1e1   :  { %v711_v14 = vpop.f32.mrb[13].mxu1 }
 0x1e2   :  { %v715_v15 = vmax.f32 %v709_v13, %v711_v14 }
 0x1e4   :  { %v716_v16 = vmax.f32 %v714_v10, %v715_v15 }
 0x1e6   :  { %717 = vmax.xlane.f32.xlu0 %v716_v16 }
 0x26d   :  { %v515_v0 = vpop.xlane.xlu0 %514 }
 0x26e   :  { %v516_v17 = vsub.f32 %v435_v3, %v515_v0  ;;  %v517_v18 = vsub.f32 %v437_v4, %v515_v0  ;;  %v518_v19 = vsub.f32 %v506_v7, %v515_v0  ;;  %v519_v20 = vsub.f32 %v508_v9, %v515_v0 }
 0x270   :  { %v520_v21 = vmul.f32 1.442695, %v516_v17  ;;  %v522_v22 = vmul.f32 1.442695, %v517_v18  ;;  %v524_v23 = vmul.f32 1.442695, %v518_v19 }
 0x271   :  { %v526_v24 = vmul.f32 1.442695, %v519_v20 }
 0x272   :  { %847 = vpow2.f32 %v520_v21 }
 0x273   :  { %849 = vpow2.f32 %v522_v22  ;;  %v718_v25 = vpop.xlane.xlu0 %717 }
 0x274   :  { %851 = vpow2.f32 %v524_v23  ;;  %v719_v26 = vsub.f32 %v638_v6, %v718_v25  ;;  %v720_v27 = vsub.f32 %v640_v8, %v718_v25  ;;  %v721_v28 = vsub.f32 %v709_v13, %v718_v25 }
 0x275   :  { %v722_v29 = vsub.f32 %v711_v14, %v718_v25  ;;  %853 = vpow2.f32 %v526_v24 }
 0x276   :  { %v723_v30 = vmul.f32 1.442695, %v719_v26  ;;  %v725_v31 = vmul.f32 1.442695, %v720_v27  ;;  %v727_v32 = vmul.f32 1.442695, %v721_v28 }
 0x277   :  { %v729_v33 = vmul.f32 1.442695, %v722_v29 }
 0x278   :  { %855 = vpow2.f32 %v723_v30 }
 0x279   :  { %857 = vpow2.f32 %v725_v31 }
 0x27a   :  { %859 = vpow2.f32 %v727_v32 }
 0x27b   :  { %861 = vpow2.f32 %v729_v33 }
 0x27c   :  { %v848_v34 = vpop.eup %847 }
 0x27d   :  { %v850_v35 = vpop.eup %849 }
 0x27e   :  { %v528_v36 = vadd.f32 %v850_v35, %v848_v34  ;;  %v852_v37 = vpop.eup %851 }
 0x27f   :  { %v854_v39 = vpop.eup %853 }
 0x280   :  { %v529_v38 = vadd.f32 %v852_v37, %v528_v36 }
 0x282   :  { %v530_v40 = vadd.f32 %v854_v39, %v529_v38  ;;  %v856_v41 = vpop.eup %855 }
 0x283   :  { %v858_v42 = vpop.eup %857 }
 0x284   :  { %531 = vadd.xlane.f32.xlu1 %v530_v40  ;;  %v731_v43 = vadd.f32 %v858_v42, %v856_v41  ;;  %v860_v44 = vpop.eup %859 }
 0x285   :  { %v862_v46 = vpop.eup %861 }
 0x286   :  { %v732_v45 = vadd.f32 %v860_v44, %v731_v43 }
 0x288   :  { %v733_v47 = vadd.f32 %v862_v46, %v732_v45 }
 0x28a   :  { %734 = vadd.xlane.f32.xlu1 %v733_v47 }
 0x311   :  { %v532_v48 = vpop.xlane.xlu1 %531 }
 0x312   :  { %863 = vrcp.f32 %v532_v48 }
 0x317   :  { %v735_v49 = vpop.xlane.xlu1 %734 }
 0x318   :  { %865 = vrcp.f32 %v735_v49 }
 0x31c   :  { %v864_v50 = vpop.eup %863 }
 0x31d   :  { %v534_v51 = vmul.f32 %v864_v50, %v532_v48 }
 0x31f   :  { %v535_v52 = vsub.f32 2.0, %v534_v51 }
 0x321   :  { %v536_v53 = vmul.f32 %v864_v50, %v535_v52 }
 0x322   :  { %v866_v54 = vpop.eup %865 }
 0x323   :  { %v537_v55 = vmul.f32 %v848_v34, %v536_v53  ;;  %v538_v56 = vmul.f32 %v850_v35, %v536_v53  ;;  %v539_v57 = vmul.f32 %v852_v37, %v536_v53  ;;  %v540_v58 = vmul.f32 %v854_v39, %v536_v53 }
 0x324   :  { %v737_v59 = vmul.f32 %v866_v54, %v735_v49 }
 0x325   :  { %541 = vst [vmem:[#allocation6] sm:$0xff] %v537_v55  ;;  %542 = vst [vmem:[#allocation6 + $0x8] sm:$0xff] %v538_v56 }
 0x326   :  { %543 = vst [vmem:[#allocation6 + $0x10] sm:$0xff] %v539_v57  ;;  %544 = vst [vmem:[#allocation6 + $0x18] sm:$0xff] %v540_v58  ;;  %v738_v60 = vsub.f32 2.0, %v737_v59 }
 0x328   :  { %v739_v61 = vmul.f32 %v866_v54, %v738_v60 }
 0x32a   :  { %v740_v62 = vmul.f32 %v856_v41, %v739_v61  ;;  %v741_v63 = vmul.f32 %v858_v42, %v739_v61  ;;  %v742_v1 = vmul.f32 %v860_v44, %v739_v61  ;;  %v743_v2 = vmul.f32 %v862_v46, %v739_v61 }
 0x32c   :  { %745 = vst [vmem:[#allocation6 + $0x20] sm:$0xff] %v740_v62  ;;  %746 = vst [vmem:[#allocation6 + $0x28] sm:$0xff] %v741_v63 }
 0x32d   :  { %747 = vst [vmem:[#allocation6 + $0x30] sm:$0xff] %v742_v1  ;;  %748 = vst [vmem:[#allocation6 + $0x38] sm:$0xff] %v743_v2 }
 0x32e   :  { %900 = shalt.err (!%p897_p12)
}
 0x32f   :  { %s901_s18 = scalar_lea.hbm %s1024_s2, 1024 }
 0x330   :  { %p902_p13 = scmp.ne.s32.totalorder %s1024_s2, %s901_s18  ;;  %p905_p0 = scmp.lt.u32.totalorder %s901_s18, %s1024_s2 }
 0x332   :  { %p907_p1 = pnand %p905_p0, %p902_p13 }
 0x334   :  { %910 = shalt.err (!%p907_p1)
}
 0x335   :  { %760 = dma.vmem_to_hbm [thread:$0]  %s755_s14, 1024, %s1024_s2, [#allocation5], %s916_s19, %s916_s19, %s917_s20  }
 0x336   :  { %913 = dma.done.wait [#allocation5], 1024  }
 0x337   :  { %914 = vsyncadd [#allocation5], 4294966272 }
 0x338   :  { %764 = vsyncpa [#allocation4], 1 }
 0x339   :  { %765 = vsyncpa [#allocation5], 1 }

</bundles_post_ra>
